<compile_context>
chip_gen: v6e
topology: v6e:2x2x1
jax: 0.10.0
libtpu: 0.0.40
codegen_flags: <defaults>
</compile_context>

<pallas_src>
import functools

import jax
import jax.numpy as jnp
import numpy as np
from jax import lax
from jax.experimental import pallas as pl
from jax.experimental.pallas import tpu as pltpu


# ---------------------------------------------------------------------------
# 1) Inverted dropout: tiny elementwise Pallas kernel (VPU work, run once).
# ---------------------------------------------------------------------------
def _dropout_kernel(x_ref, u_ref, o_ref, *, keep_prob):
    inv_keep = jnp.float32(1.0 / keep_prob)
    x = x_ref[...].astype(jnp.float32)
    kept = jnp.where(u_ref[...] < jnp.float32(keep_prob), x * inv_keep, 0.0)
    o_ref[...] = kept.astype(o_ref.dtype)


def _apply_dropout(x, key, dropout, *, tr=512):
    N, D = x.shape
    keep = 1.0 - float(dropout)
    # Portable randomness (no TPU-only PRNG primitives inside the kernel).
    u = jax.random.uniform(key, (N, D), dtype=jnp.float32)
    tr = min(tr, N)
    assert N % tr == 0, "N must tile evenly for the dropout kernel"
    return pl.pallas_call(
        functools.partial(_dropout_kernel, keep_prob=keep),
        out_shape=jax.ShapeDtypeStruct((N, D), x.dtype),
        grid=(N // tr,),
        in_specs=[
            pl.BlockSpec((tr, D), lambda i: (i, 0)),
            pl.BlockSpec((tr, D), lambda i: (i, 0)),
        ],
        out_specs=pl.BlockSpec((tr, D), lambda i: (i, 0)),
        compiler_params=pltpu.CompilerParams(
            dimension_semantics=("parallel",)),
    )(x, u)


# ---------------------------------------------------------------------------
# 2) Inner-product decode: pure NT block matmul on the MXU.
# ---------------------------------------------------------------------------
def _decode_kernel_resident(a_ref, h_ref, o_ref, *, act, tn):
    # RHS (the full dropped embedding matrix) is VMEM-resident; slice the
    # j-th row block out of it.
    j = pl.program_id(1)
    start = pl.multiple_of(j * tn, tn)
    a = a_ref[...]                       # (tm, D)
    b = h_ref[pl.ds(start, tn), :]       # (tn, D)
    x = lax.dot_general(a, b,
                        dimension_numbers=(((1,), (1,)), ((), ())),
                        preferred_element_type=jnp.float32)
    o_ref[...] = act(x).astype(o_ref.dtype)


def _decode_kernel_tiled(a_ref, b_ref, o_ref, *, act):
    # Fallback path when N*D is too large to keep the RHS resident.
    x = lax.dot_general(a_ref[...], b_ref[...],
                        dimension_numbers=(((1,), (1,)), ((), ())),
                        preferred_element_type=jnp.float32)
    o_ref[...] = act(x).astype(o_ref.dtype)


def inner_product_decoder(inputs, *, dropout=0.0, training=False, key=None,
                          act=lambda x: x, tm=512, tn=512):
    """Pallas implementation of gae.layers.InnerProductDecoder.forward."""
    N, D = inputs.shape

    # Dropout applied exactly once to h (matches the PyTorch reference, and
    # guarantees the same mask on both sides of the product => symmetric out).
    h = inputs
    if training and dropout > 0.0:
        if key is None:
            key = jax.random.PRNGKey(0)
        h = _apply_dropout(h, key, dropout)

    tm = min(tm, N)
    tn = min(tn, N)
    assert N % tm == 0 and N % tn == 0, "N must tile evenly for this kernel"

    itemsize = jnp.dtype(inputs.dtype).itemsize
    # Keep the whole RHS in VMEM when it is small (D is tiny for GAE latents).
    rhs_resident = (N * D * itemsize) <= (8 << 20)

    if rhs_resident:
        rhs_spec = pl.BlockSpec((N, D), lambda i, j: (0, 0))
        kernel = functools.partial(_decode_kernel_resident, act=act, tn=tn)
        rhs_bytes = 2 * N * D * itemsize
    else:
        rhs_spec = pl.BlockSpec((tn, D), lambda i, j: (j, 0))
        kernel = functools.partial(_decode_kernel_tiled, act=act)
        rhs_bytes = 2 * tn * D * itemsize

    needed = (2 * tm * tn * itemsize      # double-buffered output tile
              + 2 * tm * D * itemsize     # double-buffered LHS tile
              + rhs_bytes                 # RHS (resident or double-buffered)
              + (4 << 20))                # margin
    vmem_limit = int(min(max(needed, 16 << 20), 64 << 20))

    return pl.pallas_call(
        kernel,
        out_shape=jax.ShapeDtypeStruct((N, N), inputs.dtype),
        grid_spec=pltpu.PrefetchScalarGridSpec(
            num_scalar_prefetch=0,
            grid=(N // tm, N // tn),
            in_specs=[
                pl.BlockSpec((tm, D), lambda i, j: (i, 0)),  # LHS row block
                rhs_spec,                                    # RHS (resident/tiled)
            ],
            out_specs=pl.BlockSpec((tm, tn), lambda i, j: (i, j)),
        ),
        compiler_params=pltpu.CompilerParams(
            dimension_semantics=("parallel", "parallel"),
            vmem_limit_bytes=vmem_limit),
    )(h, h)


if __name__ == "__main__":
    # Small, deterministic example: N=256 nodes, D=64 latent dims.
    key = jax.random.PRNGKey(0)
    z = jax.random.normal(key, (256, 64), dtype=jnp.float32)

    # ---- Eval mode (dropout is identity) — deployed link prediction path.
    out_eval = inner_product_decoder(z, dropout=0.5, training=False)
    out_eval = jax.block_until_ready(out_eval)
    ref_eval = z @ z.T
    np.testing.assert_allclose(np.asarray(out_eval), np.asarray(ref_eval),
                               rtol=1e-5, atol=1e-5)

    # ---- Training mode: exercises the Pallas dropout prologue.
    dkey = jax.random.PRNGKey(42)
    out_train = inner_product_decoder(z, dropout=0.5, training=True, key=dkey)
    out_train = jax.block_until_ready(out_train)
    assert out_train.shape == (256, 256)

    # Exact reference with the same uniforms (keep=0.5 -> 1/keep is exact).
    u = jax.random.uniform(dkey, z.shape, dtype=jnp.float32)
    h_ref = jnp.where(u < 0.5, z / 0.5, 0.0)
    ref_train = h_ref @ h_ref.T
    np.testing.assert_allclose(np.asarray(out_train), np.asarray(ref_train),
                               rtol=1e-4, atol=1e-4)
    # Dropout applied once to h => output must be symmetric.
    np.testing.assert_allclose(np.asarray(out_train),
                               np.asarray(out_train).T, rtol=1e-4, atol=1e-4)

    print("KERNEL_OK")
</pallas_src>

<mosaic_0001>
module attributes {stable_mosaic.version = 11 : i64} {
  func.func @_decode_kernel_resident(%arg0: i32, %arg1: i32, %arg2: memref<256x64xf32, #tpu.memory_space<vmem>>, %arg3: memref<256x64xf32, #tpu.memory_space<vmem>>, %arg4: memref<256x256xf32, #tpu.memory_space<vmem>>) attributes {dimension_semantics = [#tpu.dimension_semantics<parallel>, #tpu.dimension_semantics<parallel>], iteration_bounds = array<i64: 1, 1>, scalar_prefetch = 0 : i64, scratch_operands = 0 : i64, tpu.core_type = #tpu.core_type<tc>, window_params = [{transform_indices = @transform_0, window_bounds = array<i64: 256, 64>}, {pipeline_mode = #tpu.pipeline_mode<synchronous>, transform_indices = @transform_1, window_bounds = array<i64: 256, 64>}, {transform_indices = @transform_2, window_bounds = array<i64: 256, 256>}]} {
    %c256_i32 = arith.constant 256 : i32
    %0 = arith.muli %arg1, %c256_i32 : i32
    %1 = tpu.assume_multiple %0, 256 : i32
    %c0 = arith.constant 0 : index
    %c0_0 = arith.constant 0 : index
    %2 = vector.load %arg2[%c0, %c0_0] : memref<256x64xf32, #tpu.memory_space<vmem>>, vector<256x64xf32>
    %3 = arith.index_cast %1 : i32 to index
    %c0_1 = arith.constant 0 : index
    %4 = vector.load %arg3[%3, %c0_1] : memref<256x64xf32, #tpu.memory_space<vmem>>, vector<256x64xf32>
    %cst = arith.constant dense<0.000000e+00> : vector<256x256xf32>
    %5 = tpu.matmul %2, %4, %cst {dimension_numbers = #tpu.dot_dimension_numbers<[1], [1], [0], [0], [0, 0, 1, 0], [], []>} : vector<256x64xf32>, vector<256x64xf32>, vector<256x256xf32> -> vector<256x256xf32>
    %c0_2 = arith.constant 0 : index
    %c0_3 = arith.constant 0 : index
    %6 = vector.load %arg4[%c0_2, %c0_3] : memref<256x256xf32, #tpu.memory_space<vmem>>, vector<256x256xf32>
    tpu.vector_store %arg4[%c0_2, %c0_3], %5 {strides = array<i32>} : memref<256x256xf32, #tpu.memory_space<vmem>>, vector<256x256xf32>,
    return
  }
  func.func @transform_0(%arg0: i32, %arg1: i32) -> (i32, i32) {
    %c0_i32 = arith.constant 0 : i32
    %c0_i32_0 = arith.constant 0 : i32
    return %arg0, %c0_i32 : i32, i32
  }
  func.func @transform_1(%arg0: i32, %arg1: i32) -> (i32, i32) {
    %c0_i32 = arith.constant 0 : i32
    %c0_i32_0 = arith.constant 0 : i32
    %c0_i32_1 = arith.constant 0 : i32
    return %c0_i32, %c0_i32_0 : i32, i32
  }
  func.func @transform_2(%arg0: i32, %arg1: i32) -> (i32, i32) {
    %c0_i32 = arith.constant 0 : i32
    return %arg0, %arg1 : i32, i32
  }
}

</mosaic_0001>

<bundles_post_ra>
// kernel: tpu_custom_call.1
= control target key start
LH: loop header
LB: loop body
LE: loop exit
PB: predicated region body
PF: predicated region fallthrough
CT: control target
= control target key end

     0   :  { %vm78_vm0 = vcmask 523264   ;;  %s1174_s0 = inlined_call_operand.vmem [shape: f32[256,64], index: 0, kind: input, shape index: {}]   ;;  %s1175_s1 = inlined_call_operand.vmem [shape: f32[256,64], index: 1, kind: input, shape index: {}]   ;;  %s1176_s2 = inlined_call_operand.hbm [shape: f32[256,256], index: 2, kind: output, shape index: {}]  }
   0x1   :  { %v77_v0 = vld [vmem:[%s1175_s1 + $0xf8] sm:$0xff]  ;;  %v76_v2 = vld [vmem:[%s1175_s1 + $0xf0] sm:$0xff]  ;;  %v75_v4 = vld [vmem:[%s1175_s1 + $0xe8] sm:$0xff] }
   0x2   :  { %v61_v1 = vld [vmem:[%s1175_s1 + $0x78] sm:$0xff]  ;;  %672 = vmatprep.subr.msk.mxu0 %vm78_vm0, %v77_v0  ;;  %768 = vmatprep.subr.msk.mxu1 %vm78_vm0, %v77_v0  ;;  %v60_v3 = vld [vmem:[%s1175_s1 + $0x70] sm:$0xff]  ;;  %v59_v5 = vld [vmem:[%s1175_s1 + $0x68] sm:$0xff] }
   0x3   :  { %673 = vmatpush3.xpose.msk.msra.mxu0 %vm78_vm0, %v61_v1  ;;  %784 = vmatpush3.xpose.msk.msra.mxu1 %vm78_vm0, %v61_v1  ;;  %v74_v6 = vld [vmem:[%s1175_s1 + $0xe0] sm:$0xff]  ;;  %v73_v10 = vld [vmem:[%s1175_s1 + $0xd8] sm:$0xff]  ;;  %v72_v12 = vld [vmem:[%s1175_s1 + $0xd0] sm:$0xff] }
   0x4   :  { %674 = vmatprep.subr.msk.mxu0 %vm78_vm0, %v76_v2  ;;  %769 = vmatprep.subr.msk.mxu1 %vm78_vm0, %v76_v2  ;;  %v879_v7 = vld [vmem:[%s1174_s0] sm:$0xff]  ;;  %v57_v11 = vld [vmem:[%s1175_s1 + $0x58] sm:$0xff]  ;;  %v56_v13 = vld [vmem:[%s1175_s1 + $0x50] sm:$0xff] }
   0x5   :  { %v58_v8 = vld [vmem:[%s1175_s1 + $0x60] sm:$0xff]  ;;  %704 = vmatprep.mubr.msk.f32.mxu0 %vm78_vm0, %v879_v7  ;;  %v71_v14 = vld [vmem:[%s1175_s1 + $0xc8] sm:$0xff] }
   0x6   :  { %v889_v9 = vld [vmem:[%s1174_s0 + $0x80] sm:$0xff] }
   0x7   :  { %675 = vmatpush3.xpose.msk.msra.mxu0 %vm78_vm0, %v60_v3  ;;  %785 = vmatpush3.xpose.msk.msra.mxu1 %vm78_vm0, %v60_v3 }
   0x8   :  { %676 = vmatprep.subr.msk.mxu0 %vm78_vm0, %v75_v4  ;;  %770 = vmatprep.subr.msk.mxu1 %vm78_vm0, %v75_v4 }
   0x9   :  { %736 = vmatprep.mubr.msk.f32.mxu1 %vm78_vm0, %v889_v9 }
   0xb   :  { %677 = vmatpush3.xpose.msk.msra.mxu0 %vm78_vm0, %v59_v5  ;;  %786 = vmatpush3.xpose.msk.msra.mxu1 %vm78_vm0, %v59_v5 }
   0xc   :  { %678 = vmatprep.subr.msk.mxu0 %vm78_vm0, %v74_v6  ;;  %771 = vmatprep.subr.msk.mxu1 %vm78_vm0, %v74_v6 }
   0xf   :  { %679 = vmatpush3.xpose.msk.msra.mxu0 %vm78_vm0, %v58_v8  ;;  %787 = vmatpush3.xpose.msk.msra.mxu1 %vm78_vm0, %v58_v8 }
  0x10   :  { %680 = vmatprep.subr.msk.mxu0 %vm78_vm0, %v73_v10  ;;  %772 = vmatprep.subr.msk.mxu1 %vm78_vm0, %v73_v10 }
  0x13   :  { %681 = vmatpush3.xpose.msk.msra.mxu0 %vm78_vm0, %v57_v11  ;;  %788 = vmatpush3.xpose.msk.msra.mxu1 %vm78_vm0, %v57_v11 }
  0x14   :  { %682 = vmatprep.subr.msk.mxu0 %vm78_vm0, %v72_v12  ;;  %773 = vmatprep.subr.msk.mxu1 %vm78_vm0, %v72_v12 }
  0x15   :  { %7 = vsyncpa [#allocation3], 0  ;;  %v55_v15 = vld [vmem:[%s1175_s1 + $0x48] sm:$0xff]  ;;  %v70_v16 = vld [vmem:[%s1175_s1 + $0xc0] sm:$0xff] }
  0x16   :  { %v54_v17 = vld [vmem:[%s1175_s1 + $0x40] sm:$0xff]  ;;  %v69_v18 = vld [vmem:[%s1175_s1 + $0xb8] sm:$0xff]  ;;  %v68_v20 = vld [vmem:[%s1175_s1 + $0xb0] sm:$0xff] }
  0x17   :  { %683 = vmatpush3.xpose.msk.msra.mxu0 %vm78_vm0, %v56_v13  ;;  %789 = vmatpush3.xpose.msk.msra.mxu1 %vm78_vm0, %v56_v13  ;;  %v53_v19 = vld [vmem:[%s1175_s1 + $0x38] sm:$0xff]  ;;  %v52_v21 = vld [vmem:[%s1175_s1 + $0x30] sm:$0xff]  ;;  %v67_v22 = vld [vmem:[%s1175_s1 + $0xa8] sm:$0xff] }
  0x18   :  { %684 = vmatprep.subr.msk.mxu0 %vm78_vm0, %v71_v14  ;;  %774 = vmatprep.subr.msk.mxu1 %vm78_vm0, %v71_v14  ;;  %v51_v23 = vld [vmem:[%s1175_s1 + $0x28] sm:$0xff]  ;;  %v66_v24 = vld [vmem:[%s1175_s1 + $0xa0] sm:$0xff]  ;;  %v65_v26 = vld [vmem:[%s1175_s1 + $0x98] sm:$0xff] }
  0x19   :  { %v50_v25 = vld [vmem:[%s1175_s1 + $0x20] sm:$0xff]  ;;  %v49_v27 = vld [vmem:[%s1175_s1 + $0x18] sm:$0xff]  ;;  %v64_v28 = vld [vmem:[%s1175_s1 + $0x90] sm:$0xff] }
  0x1a   :  { %v48_v29 = vld [vmem:[%s1175_s1 + $0x10] sm:$0xff]  ;;  %v63_v30 = vld [vmem:[%s1175_s1 + $0x88] sm:$0xff]  ;;  %v62_v32 = vld [vmem:[%s1175_s1 + $0x80] sm:$0xff] }
  0x1b   :  { %685 = vmatpush3.xpose.msk.msra.mxu0 %vm78_vm0, %v55_v15  ;;  %790 = vmatpush3.xpose.msk.msra.mxu1 %vm78_vm0, %v55_v15  ;;  %v47_v31 = vld [vmem:[%s1175_s1 + $0x8] sm:$0xff]  ;;  %v46_v33 = vld [vmem:[%s1175_s1] sm:$0xff]  ;;  %v15_v36 = vld [vmem:[%s1174_s0 + $0x10] sm:$0xff] }
  0x1c   :  { %686 = vmatprep.subr.msk.mxu0 %vm78_vm0, %v70_v16  ;;  %775 = vmatprep.subr.msk.mxu1 %vm78_vm0, %v70_v16  ;;  %v14_v34 = vld [vmem:[%s1174_s0 + $0x8] sm:$0xff]  ;;  %v31_v37 = vld [vmem:[%s1174_s0 + $0x90] sm:$0xff]  ;;  %v16_v38 = vld [vmem:[%s1174_s0 + $0x18] sm:$0xff] }
  0x1d   :  { %v30_v35 = vld [vmem:[%s1174_s0 + $0x88] sm:$0xff]  ;;  %v32_v39 = vld [vmem:[%s1174_s0 + $0x98] sm:$0xff]  ;;  %v17_v40 = vld [vmem:[%s1174_s0 + $0x20] sm:$0xff] }
  0x1e   :  { %v33_v41 = vld [vmem:[%s1174_s0 + $0xa0] sm:$0xff]  ;;  %v18_v42 = vld [vmem:[%s1174_s0 + $0x28] sm:$0xff]  ;;  %v19_v44 = vld [vmem:[%s1174_s0 + $0x30] sm:$0xff] }
  0x1f   :  { %687 = vmatpush3.xpose.msk.msra.mxu0 %vm78_vm0, %v54_v17  ;;  %791 = vmatpush3.xpose.msk.msra.mxu1 %vm78_vm0, %v54_v17  ;;  %v34_v43 = vld [vmem:[%s1174_s0 + $0xa8] sm:$0xff]  ;;  %v35_v45 = vld [vmem:[%s1174_s0 + $0xb0] sm:$0xff]  ;;  %v20_v46 = vld [vmem:[%s1174_s0 + $0x38] sm:$0xff] }
  0x20   :  { %688 = vmatprep.subr.msk.mxu0 %vm78_vm0, %v69_v18  ;;  %776 = vmatprep.subr.msk.mxu1 %vm78_vm0, %v69_v18  ;;  %v36_v47 = vld [vmem:[%s1174_s0 + $0xb8] sm:$0xff]  ;;  %v21_v48 = vld [vmem:[%s1174_s0 + $0x40] sm:$0xff]  ;;  %v22_v50 = vld [vmem:[%s1174_s0 + $0x48] sm:$0xff] }
  0x21   :  { %v37_v49 = vld [vmem:[%s1174_s0 + $0xc0] sm:$0xff]  ;;  %v38_v51 = vld [vmem:[%s1174_s0 + $0xc8] sm:$0xff]  ;;  %v23_v52 = vld [vmem:[%s1174_s0 + $0x50] sm:$0xff] }
  0x22   :  { %v39_v53 = vld [vmem:[%s1174_s0 + $0xd0] sm:$0xff]  ;;  %v24_v54 = vld [vmem:[%s1174_s0 + $0x58] sm:$0xff]  ;;  %v25_v56 = vld [vmem:[%s1174_s0 + $0x60] sm:$0xff] }
  0x23   :  { %689 = vmatpush3.xpose.msk.msra.mxu0 %vm78_vm0, %v53_v19  ;;  %792 = vmatpush3.xpose.msk.msra.mxu1 %vm78_vm0, %v53_v19  ;;  %v40_v55 = vld [vmem:[%s1174_s0 + $0xd8] sm:$0xff]  ;;  %v41_v57 = vld [vmem:[%s1174_s0 + $0xe0] sm:$0xff]  ;;  %v26_v58 = vld [vmem:[%s1174_s0 + $0x68] sm:$0xff] }
  0x24   :  { %690 = vmatprep.subr.msk.mxu0 %vm78_vm0, %v68_v20  ;;  %777 = vmatprep.subr.msk.mxu1 %vm78_vm0, %v68_v20  ;;  %v42_v59 = vld [vmem:[%s1174_s0 + $0xe8] sm:$0xff]  ;;  %v27_v60 = vld [vmem:[%s1174_s0 + $0x70] sm:$0xff]  ;;  %v28_v62 = vld [vmem:[%s1174_s0 + $0x78] sm:$0xff] }
  0x25   :  { %v43_v61 = vld [vmem:[%s1174_s0 + $0xf0] sm:$0xff]  ;;  %v44_v63 = vld [vmem:[%s1174_s0 + $0xf8] sm:$0xff]  ;;  %s825_s0 = smov [#allocation2]  }
  0x26   :  { %s597_s23 = sshll.u32 %s825_s0, 4  ;;  %s598_s23 = int_to_ptr.vmem [resolvable:$true] %s597_s23 }
  0x27   :  { %691 = vmatpush3.xpose.msk.msra.mxu0 %vm78_vm0, %v52_v21  ;;  %793 = vmatpush3.xpose.msk.msra.mxu1 %vm78_vm0, %v52_v21  ;;  %s803_s24 = scalar_lea.vmem %s598_s23, 8192  ;;  %p808_p1 = scmp.lt.s32.totalorder %s598_s23, %s598_s23 }
  0x28   :  { %692 = vmatprep.subr.msk.mxu0 %vm78_vm0, %v67_v22  ;;  %778 = vmatprep.subr.msk.mxu1 %vm78_vm0, %v67_v22  ;;  %p804_p0 = scmp.ne.s32.totalorder %s598_s23, %s803_s24  ;;  %p809_p2 = scmp.lt.s32.totalorder %s803_s24, %s803_s24 }
  0x2a   :  { %p810_p3 = por %p809_p2, %p808_p1 }
  0x2b   :  { %693 = vmatpush3.xpose.msk.msra.mxu0 %vm78_vm0, %v51_v23  ;;  %794 = vmatpush3.xpose.msk.msra.mxu1 %vm78_vm0, %v51_v23 }
  0x2c   :  { %694 = vmatprep.subr.msk.mxu0 %vm78_vm0, %v66_v24  ;;  %779 = vmatprep.subr.msk.mxu1 %vm78_vm0, %v66_v24  ;;  %p811_p4 = pnand %p810_p3, %p804_p0 }
  0x2f   :  { %695 = vmatpush3.xpose.msk.msra.mxu0 %vm78_vm0, %v50_v25  ;;  %795 = vmatpush3.xpose.msk.msra.mxu1 %vm78_vm0, %v50_v25 }
  0x30   :  { %696 = vmatprep.subr.msk.mxu0 %vm78_vm0, %v65_v26  ;;  %780 = vmatprep.subr.msk.mxu1 %vm78_vm0, %v65_v26 }
  0x33   :  { %697 = vmatpush3.xpose.msk.msra.mxu0 %vm78_vm0, %v49_v27  ;;  %796 = vmatpush3.xpose.msk.msra.mxu1 %vm78_vm0, %v49_v27 }
  0x34   :  { %698 = vmatprep.subr.msk.mxu0 %vm78_vm0, %v64_v28  ;;  %781 = vmatprep.subr.msk.mxu1 %vm78_vm0, %v64_v28 }
  0x37   :  { %699 = vmatpush3.xpose.msk.msra.mxu0 %vm78_vm0, %v48_v29  ;;  %797 = vmatpush3.xpose.msk.msra.mxu1 %vm78_vm0, %v48_v29 }
  0x38   :  { %700 = vmatprep.subr.msk.mxu0 %vm78_vm0, %v63_v30  ;;  %782 = vmatprep.subr.msk.mxu1 %vm78_vm0, %v63_v30 }
  0x3b   :  { %701 = vmatpush3.xpose.msk.msra.mxu0 %vm78_vm0, %v47_v31  ;;  %798 = vmatpush3.xpose.msk.msra.mxu1 %vm78_vm0, %v47_v31 }
  0x3c   :  { %702 = vmatprep.subr.msk.mxu0 %vm78_vm0, %v62_v32  ;;  %783 = vmatprep.subr.msk.mxu1 %vm78_vm0, %v62_v32 }
  0x3f   :  { %703 = vmatpush3.xpose.msk.msra.mxu0 %vm78_vm0, %v46_v33  ;;  %799 = vmatpush3.xpose.msk.msra.mxu1 %vm78_vm0, %v46_v33 }
  0x42   :  { %705 = vmatmul.mubr.msk.f32.vlgmr.msra.gmra.mxu0 %vm78_vm0, %v879_v7  ;;  %737 = vmatmul.mubr.msk.f32.vlgmr.msra.gmra.mxu1 %vm78_vm0, %v889_v9 }
  0x43   :  { %706 = vmatprep.mubr.msk.f32.mxu0 %vm78_vm0, %v14_v34  ;;  %738 = vmatprep.mubr.msk.f32.mxu1 %vm78_vm0, %v30_v35 }
  0x46   :  { %707 = vmatmul.mubr.msk.f32.gmra.mxu0 %vm78_vm0, %v14_v34  ;;  %739 = vmatmul.mubr.msk.f32.gmra.mxu1 %vm78_vm0, %v30_v35 }
  0x47   :  { %708 = vmatprep.mubr.msk.f32.mxu0 %vm78_vm0, %v15_v36  ;;  %740 = vmatprep.mubr.msk.f32.mxu1 %vm78_vm0, %v31_v37 }
  0x4a   :  { %709 = vmatmul.mubr.msk.f32.gmra.mxu0 %vm78_vm0, %v15_v36  ;;  %741 = vmatmul.mubr.msk.f32.gmra.mxu1 %vm78_vm0, %v31_v37 }
  0x4b   :  { %710 = vmatprep.mubr.msk.f32.mxu0 %vm78_vm0, %v16_v38  ;;  %742 = vmatprep.mubr.msk.f32.mxu1 %vm78_vm0, %v32_v39 }
  0x4e   :  { %711 = vmatmul.mubr.msk.f32.gmra.mxu0 %vm78_vm0, %v16_v38  ;;  %743 = vmatmul.mubr.msk.f32.gmra.mxu1 %vm78_vm0, %v32_v39 }
  0x4f   :  { %712 = vmatprep.mubr.msk.f32.mxu0 %vm78_vm0, %v17_v40  ;;  %744 = vmatprep.mubr.msk.f32.mxu1 %vm78_vm0, %v33_v41 }
  0x52   :  { %713 = vmatmul.mubr.msk.f32.gmra.mxu0 %vm78_vm0, %v17_v40  ;;  %745 = vmatmul.mubr.msk.f32.gmra.mxu1 %vm78_vm0, %v33_v41 }
  0x53   :  { %714 = vmatprep.mubr.msk.f32.mxu0 %vm78_vm0, %v18_v42  ;;  %746 = vmatprep.mubr.msk.f32.mxu1 %vm78_vm0, %v34_v43 }
  0x56   :  { %715 = vmatmul.mubr.msk.f32.gmra.mxu0 %vm78_vm0, %v18_v42  ;;  %747 = vmatmul.mubr.msk.f32.gmra.mxu1 %vm78_vm0, %v34_v43 }
  0x57   :  { %716 = vmatprep.mubr.msk.f32.mxu0 %vm78_vm0, %v19_v44  ;;  %748 = vmatprep.mubr.msk.f32.mxu1 %vm78_vm0, %v35_v45 }
  0x5a   :  { %717 = vmatmul.mubr.msk.f32.gmra.mxu0 %vm78_vm0, %v19_v44  ;;  %749 = vmatmul.mubr.msk.f32.gmra.mxu1 %vm78_vm0, %v35_v45 }
  0x5b   :  { %718 = vmatprep.mubr.msk.f32.mxu0 %vm78_vm0, %v20_v46  ;;  %750 = vmatprep.mubr.msk.f32.mxu1 %vm78_vm0, %v36_v47 }
  0x5e   :  { %719 = vmatmul.mubr.msk.f32.gmra.mxu0 %vm78_vm0, %v20_v46  ;;  %751 = vmatmul.mubr.msk.f32.gmra.mxu1 %vm78_vm0, %v36_v47 }
  0x5f   :  { %720 = vmatprep.mubr.msk.f32.mxu0 %vm78_vm0, %v21_v48  ;;  %752 = vmatprep.mubr.msk.f32.mxu1 %vm78_vm0, %v37_v49 }
  0x62   :  { %721 = vmatmul.mubr.msk.f32.gmra.mxu0 %vm78_vm0, %v21_v48  ;;  %753 = vmatmul.mubr.msk.f32.gmra.mxu1 %vm78_vm0, %v37_v49 }
  0x63   :  { %722 = vmatprep.mubr.msk.f32.mxu0 %vm78_vm0, %v22_v50  ;;  %754 = vmatprep.mubr.msk.f32.mxu1 %vm78_vm0, %v38_v51 }
  0x66   :  { %723 = vmatmul.mubr.msk.f32.gmra.mxu0 %vm78_vm0, %v22_v50  ;;  %755 = vmatmul.mubr.msk.f32.gmra.mxu1 %vm78_vm0, %v38_v51 }
  0x67   :  { %724 = vmatprep.mubr.msk.f32.mxu0 %vm78_vm0, %v23_v52  ;;  %756 = vmatprep.mubr.msk.f32.mxu1 %vm78_vm0, %v39_v53 }
  0x6a   :  { %725 = vmatmul.mubr.msk.f32.gmra.mxu0 %vm78_vm0, %v23_v52  ;;  %757 = vmatmul.mubr.msk.f32.gmra.mxu1 %vm78_vm0, %v39_v53 }
  0x6b   :  { %726 = vmatprep.mubr.msk.f32.mxu0 %vm78_vm0, %v24_v54  ;;  %758 = vmatprep.mubr.msk.f32.mxu1 %vm78_vm0, %v40_v55 }
  0x6e   :  { %727 = vmatmul.mubr.msk.f32.gmra.mxu0 %vm78_vm0, %v24_v54  ;;  %759 = vmatmul.mubr.msk.f32.gmra.mxu1 %vm78_vm0, %v40_v55 }
  0x6f   :  { %728 = vmatprep.mubr.msk.f32.mxu0 %vm78_vm0, %v25_v56  ;;  %760 = vmatprep.mubr.msk.f32.mxu1 %vm78_vm0, %v41_v57 }
  0x72   :  { %729 = vmatmul.mubr.msk.f32.gmra.mxu0 %vm78_vm0, %v25_v56  ;;  %761 = vmatmul.mubr.msk.f32.gmra.mxu1 %vm78_vm0, %v41_v57 }
  0x73   :  { %730 = vmatprep.mubr.msk.f32.mxu0 %vm78_vm0, %v26_v58  ;;  %762 = vmatprep.mubr.msk.f32.mxu1 %vm78_vm0, %v42_v59 }
  0x76   :  { %731 = vmatmul.mubr.msk.f32.gmra.mxu0 %vm78_vm0, %v26_v58  ;;  %763 = vmatmul.mubr.msk.f32.gmra.mxu1 %vm78_vm0, %v42_v59 }
  0x77   :  { %732 = vmatprep.mubr.msk.f32.mxu0 %vm78_vm0, %v27_v60  ;;  %764 = vmatprep.mubr.msk.f32.mxu1 %vm78_vm0, %v43_v61 }
  0x7a   :  { %733 = vmatmul.mubr.msk.f32.gmra.mxu0 %vm78_vm0, %v27_v60  ;;  %765 = vmatmul.mubr.msk.f32.gmra.mxu1 %vm78_vm0, %v43_v61 }
  0x7b   :  { %734 = vmatprep.mubr.msk.f32.mxu0 %vm78_vm0, %v28_v62  ;;  %766 = vmatprep.mubr.msk.f32.mxu1 %vm78_vm0, %v44_v63 }
  0x7e   :  { %735 = vmatmul.mubr.msk.f32.gmra.mxu0 %vm78_vm0, %v28_v62  ;;  %767 = vmatmul.mubr.msk.f32.gmra.mxu1 %vm78_vm0, %v44_v63 }
 0x102   :  { %v337_v0 = vpop.f32.mrf.mxu0  ;;  %v433_v1 = vpop.f32.mrf.mxu1 }
 0x103   :  { %528 = vst [vmem:[#allocation2] sm:$0xff] %v337_v0  ;;  %560 = vst [vmem:[#allocation2 + $0x100] sm:$0xff] %v433_v1 }
 0x104   :  { %v339_v2 = vpop.f32.mrf.mxu0  ;;  %v435_v3 = vpop.f32.mrf.mxu1 }
 0x105   :  { %529 = vst [vmem:[#allocation2 + $0x8] sm:$0xff] %v339_v2  ;;  %561 = vst [vmem:[#allocation2 + $0x108] sm:$0xff] %v435_v3 }
 0x106   :  { %v343_v4 = vpop.f32.mrf.mxu0  ;;  %v439_v5 = vpop.f32.mrf.mxu1 }
 0x107   :  { %530 = vst [vmem:[#allocation2 + $0x10] sm:$0xff] %v343_v4  ;;  %562 = vst [vmem:[#allocation2 + $0x110] sm:$0xff] %v439_v5 }
 0x108   :  { %v345_v6 = vpop.f32.mrf.mxu0  ;;  %v441_v7 = vpop.f32.mrf.mxu1 }
 0x109   :  { %531 = vst [vmem:[#allocation2 + $0x18] sm:$0xff] %v345_v6  ;;  %563 = vst [vmem:[#allocation2 + $0x118] sm:$0xff] %v441_v7 }
 0x10a   :  { %v349_v8 = vpop.f32.mrf.mxu0  ;;  %v445_v9 = vpop.f32.mrf.mxu1 }
 0x10b   :  { %532 = vst [vmem:[#allocation2 + $0x20] sm:$0xff] %v349_v8  ;;  %564 = vst [vmem:[#allocation2 + $0x120] sm:$0xff] %v445_v9 }
 0x10c   :  { %v351_v10 = vpop.f32.mrf.mxu0  ;;  %v447_v11 = vpop.f32.mrf.mxu1 }
 0x10d   :  { %533 = vst [vmem:[#allocation2 + $0x28] sm:$0xff] %v351_v10  ;;  %565 = vst [vmem:[#allocation2 + $0x128] sm:$0xff] %v447_v11 }
 0x10e   :  { %v355_v12 = vpop.f32.mrf.mxu0  ;;  %v451_v13 = vpop.f32.mrf.mxu1 }
 0x10f   :  { %534 = vst [vmem:[#allocation2 + $0x30] sm:$0xff] %v355_v12  ;;  %566 = vst [vmem:[#allocation2 + $0x130] sm:$0xff] %v451_v13 }
 0x110   :  { %v357_v14 = vpop.f32.mrf.mxu0  ;;  %v453_v15 = vpop.f32.mrf.mxu1 }
 0x111   :  { %535 = vst [vmem:[#allocation2 + $0x38] sm:$0xff] %v357_v14  ;;  %567 = vst [vmem:[#allocation2 + $0x138] sm:$0xff] %v453_v15 }
 0x112   :  { %v361_v16 = vpop.f32.mrf.mxu0  ;;  %v457_v17 = vpop.f32.mrf.mxu1 }
 0x113   :  { %536 = vst [vmem:[#allocation2 + $0x40] sm:$0xff] %v361_v16  ;;  %568 = vst [vmem:[#allocation2 + $0x140] sm:$0xff] %v457_v17 }
 0x114   :  { %v363_v18 = vpop.f32.mrf.mxu0  ;;  %v459_v19 = vpop.f32.mrf.mxu1 }
 0x115   :  { %537 = vst [vmem:[#allocation2 + $0x48] sm:$0xff] %v363_v18  ;;  %569 = vst [vmem:[#allocation2 + $0x148] sm:$0xff] %v459_v19 }
 0x116   :  { %v367_v20 = vpop.f32.mrf.mxu0  ;;  %v463_v21 = vpop.f32.mrf.mxu1 }
 0x117   :  { %538 = vst [vmem:[#allocation2 + $0x50] sm:$0xff] %v367_v20  ;;  %570 = vst [vmem:[#allocation2 + $0x150] sm:$0xff] %v463_v21 }
 0x118   :  { %v369_v22 = vpop.f32.mrf.mxu0  ;;  %v465_v23 = vpop.f32.mrf.mxu1 }
 0x119   :  { %539 = vst [vmem:[#allocation2 + $0x58] sm:$0xff] %v369_v22  ;;  %571 = vst [vmem:[#allocation2 + $0x158] sm:$0xff] %v465_v23 }
 0x11a   :  { %v373_v24 = vpop.f32.mrf.mxu0  ;;  %v469_v25 = vpop.f32.mrf.mxu1 }
 0x11b   :  { %540 = vst [vmem:[#allocation2 + $0x60] sm:$0xff] %v373_v24  ;;  %572 = vst [vmem:[#allocation2 + $0x160] sm:$0xff] %v469_v25 }
 0x11c   :  { %v375_v26 = vpop.f32.mrf.mxu0  ;;  %v471_v27 = vpop.f32.mrf.mxu1 }
 0x11d   :  { %541 = vst [vmem:[#allocation2 + $0x68] sm:$0xff] %v375_v26  ;;  %573 = vst [vmem:[#allocation2 + $0x168] sm:$0xff] %v471_v27 }
 0x11e   :  { %v379_v28 = vpop.f32.mrf.mxu0  ;;  %v475_v29 = vpop.f32.mrf.mxu1 }
 0x11f   :  { %542 = vst [vmem:[#allocation2 + $0x70] sm:$0xff] %v379_v28  ;;  %574 = vst [vmem:[#allocation2 + $0x170] sm:$0xff] %v475_v29 }
 0x120   :  { %v381_v30 = vpop.f32.mrf.mxu0  ;;  %v477_v31 = vpop.f32.mrf.mxu1 }
 0x121   :  { %543 = vst [vmem:[#allocation2 + $0x78] sm:$0xff] %v381_v30  ;;  %575 = vst [vmem:[#allocation2 + $0x178] sm:$0xff] %v477_v31 }
 0x122   :  { %v385_v32 = vpop.f32.mrf.mxu0  ;;  %v481_v33 = vpop.f32.mrf.mxu1 }
 0x123   :  { %544 = vst [vmem:[#allocation2 + $0x80] sm:$0xff] %v385_v32  ;;  %576 = vst [vmem:[#allocation2 + $0x180] sm:$0xff] %v481_v33 }
 0x124   :  { %v387_v34 = vpop.f32.mrf.mxu0  ;;  %v483_v35 = vpop.f32.mrf.mxu1 }
 0x125   :  { %545 = vst [vmem:[#allocation2 + $0x88] sm:$0xff] %v387_v34  ;;  %577 = vst [vmem:[#allocation2 + $0x188] sm:$0xff] %v483_v35 }
 0x126   :  { %v391_v36 = vpop.f32.mrf.mxu0  ;;  %v487_v37 = vpop.f32.mrf.mxu1 }
 0x127   :  { %546 = vst [vmem:[#allocation2 + $0x90] sm:$0xff] %v391_v36  ;;  %578 = vst [vmem:[#allocation2 + $0x190] sm:$0xff] %v487_v37 }
 0x128   :  { %v393_v38 = vpop.f32.mrf.mxu0  ;;  %v489_v39 = vpop.f32.mrf.mxu1 }
 0x129   :  { %547 = vst [vmem:[#allocation2 + $0x98] sm:$0xff] %v393_v38  ;;  %579 = vst [vmem:[#allocation2 + $0x198] sm:$0xff] %v489_v39 }
 0x12a   :  { %v397_v40 = vpop.f32.mrf.mxu0  ;;  %v493_v41 = vpop.f32.mrf.mxu1 }
 0x12b   :  { %548 = vst [vmem:[#allocation2 + $0xa0] sm:$0xff] %v397_v40  ;;  %580 = vst [vmem:[#allocation2 + $0x1a0] sm:$0xff] %v493_v41 }
 0x12c   :  { %v399_v42 = vpop.f32.mrf.mxu0  ;;  %v495_v43 = vpop.f32.mrf.mxu1 }
 0x12d   :  { %549 = vst [vmem:[#allocation2 + $0xa8] sm:$0xff] %v399_v42  ;;  %581 = vst [vmem:[#allocation2 + $0x1a8] sm:$0xff] %v495_v43 }
 0x12e   :  { %v403_v44 = vpop.f32.mrf.mxu0  ;;  %v499_v45 = vpop.f32.mrf.mxu1 }
 0x12f   :  { %550 = vst [vmem:[#allocation2 + $0xb0] sm:$0xff] %v403_v44  ;;  %582 = vst [vmem:[#allocation2 + $0x1b0] sm:$0xff] %v499_v45 }
 0x130   :  { %v405_v46 = vpop.f32.mrf.mxu0  ;;  %v501_v47 = vpop.f32.mrf.mxu1 }
 0x131   :  { %551 = vst [vmem:[#allocation2 + $0xb8] sm:$0xff] %v405_v46  ;;  %583 = vst [vmem:[#allocation2 + $0x1b8] sm:$0xff] %v501_v47 }
 0x132   :  { %v409_v48 = vpop.f32.mrf.mxu0  ;;  %v505_v49 = vpop.f32.mrf.mxu1 }
 0x133   :  { %552 = vst [vmem:[#allocation2 + $0xc0] sm:$0xff] %v409_v48  ;;  %584 = vst [vmem:[#allocation2 + $0x1c0] sm:$0xff] %v505_v49 }
 0x134   :  { %v411_v50 = vpop.f32.mrf.mxu0  ;;  %v507_v51 = vpop.f32.mrf.mxu1 }
 0x135   :  { %553 = vst [vmem:[#allocation2 + $0xc8] sm:$0xff] %v411_v50  ;;  %585 = vst [vmem:[#allocation2 + $0x1c8] sm:$0xff] %v507_v51 }
 0x136   :  { %v415_v52 = vpop.f32.mrf.mxu0  ;;  %v511_v53 = vpop.f32.mrf.mxu1 }
 0x137   :  { %554 = vst [vmem:[#allocation2 + $0xd0] sm:$0xff] %v415_v52  ;;  %586 = vst [vmem:[#allocation2 + $0x1d0] sm:$0xff] %v511_v53 }
 0x138   :  { %v417_v54 = vpop.f32.mrf.mxu0  ;;  %v513_v55 = vpop.f32.mrf.mxu1 }
 0x139   :  { %555 = vst [vmem:[#allocation2 + $0xd8] sm:$0xff] %v417_v54  ;;  %587 = vst [vmem:[#allocation2 + $0x1d8] sm:$0xff] %v513_v55 }
 0x13a   :  { %v421_v56 = vpop.f32.mrf.mxu0  ;;  %v517_v57 = vpop.f32.mrf.mxu1 }
 0x13b   :  { %556 = vst [vmem:[#allocation2 + $0xe0] sm:$0xff] %v421_v56  ;;  %588 = vst [vmem:[#allocation2 + $0x1e0] sm:$0xff] %v517_v57 }
 0x13c   :  { %v423_v58 = vpop.f32.mrf.mxu0  ;;  %v519_v59 = vpop.f32.mrf.mxu1 }
 0x13d   :  { %557 = vst [vmem:[#allocation2 + $0xe8] sm:$0xff] %v423_v58  ;;  %589 = vst [vmem:[#allocation2 + $0x1e8] sm:$0xff] %v519_v59 }
 0x13e   :  { %v427_v60 = vpop.f32.mrf.mxu0  ;;  %v523_v61 = vpop.f32.mrf.mxu1 }
 0x13f   :  { %558 = vst [vmem:[#allocation2 + $0xf0] sm:$0xff] %v427_v60  ;;  %590 = vst [vmem:[#allocation2 + $0x1f0] sm:$0xff] %v523_v61 }
 0x140   :  { %v429_v62 = vpop.f32.mrf.mxu0  ;;  %v525_v63 = vpop.f32.mrf.mxu1 }
 0x141   :  { %559 = vst [vmem:[#allocation2 + $0xf8] sm:$0xff] %v429_v62  ;;  %591 = vst [vmem:[#allocation2 + $0x1f8] sm:$0xff] %v525_v63 }
 0x142   :  { %814 = shalt.err (!%p811_p4)
}
 0x143   :  { %s826_s1 = smov 256   ;;  %s827_s25 = smov 16  }
 0x144   :  { %603 = dma.vmem_to_hbm [thread:$0]  %s598_s23, 8192, %s1176_s2, [#allocation3], %s826_s1, %s826_s1, %s827_s25  }
 0x145   :  { %823 = dma.done.wait [#allocation3], 8192  }
 0x146   :  { %824 = vsyncadd [#allocation3], 4294959104 }
 0x147   :  { %607 = vsyncpa [#allocation3], 1 }

</bundles_post_ra>
